<compile_context>
chip_gen: v7x
topology: tpu7x:2x2x1
jax: 0.10.0
libtpu: 0.0.40
codegen_flags: <defaults>
</compile_context>

<pallas_src>
import jax
import jax.numpy as jnp
from jax.experimental import pallas as pl
from jax.experimental.pallas import tpu as pltpu


def _make_adapter_kernel(num_groups, mxu_dtype):
    """Kernel over refs: [x_g]*G + [scale_g]*G + [shift_g]*G + [w_g]*G + out."""

    def kernel(*refs):
        x_refs = refs[0:num_groups]
        s_refs = refs[num_groups:2 * num_groups]
        b_refs = refs[2 * num_groups:3 * num_groups]
        w_refs = refs[3 * num_groups:4 * num_groups]
        o_ref = refs[4 * num_groups]

        acc = None
        for x_ref, s_ref, b_ref, w_ref in zip(x_refs, s_refs, b_refs, w_refs):
            # BN affine + ReLU in f32 on the VPU (per channel group).
            x = x_ref[...].astype(jnp.float32)                     # (c_g, thw)
            y = jnp.maximum(x * s_ref[...] + b_ref[...], 0.0)
            # Partial 1x1 conv for this channel group: (cout, c_g) @ (c_g, thw)
            # bf16 operands, f32 accumulation on the MXU.
            part = jnp.dot(
                w_ref[...],
                y.astype(mxu_dtype),
                preferred_element_type=jnp.float32,
            )                                                       # (cout, thw)
            acc = part if acc is None else acc + part
        o_ref[...] = acc.astype(o_ref.dtype)

    return kernel


def _pick_hw_tile(hw, cin, cout, in_itemsize, out_itemsize, budget_bytes=24 << 20):
    # Largest lane-friendly (multiple-of-128) tile dividing H*W whose
    # double-buffered footprint fits the VMEM budget; fall back to the full
    # (untiled) HW extent, which is always a legal full-dim block.
    for t in (4096, 2048, 1024, 512, 384, 256, 128):
        if t <= hw and hw % t == 0:
            footprint = 2 * t * (cin * in_itemsize + cout * out_itemsize)
            if footprint <= budget_bytes:
                return t
    return hw


def adapter_forward(prev_features, params, *, mxu_dtype=jnp.bfloat16, out_dtype=None):
    """out = Conv1x1(ReLU(BatchNorm2d(concat(prev_features, dim=1)))), NCHW.

    BatchNorm uses inference-mode running statistics (eval semantics).
    """
    gamma = params["gamma"].astype(jnp.float32)
    beta = params["beta"].astype(jnp.float32)
    mean = params["running_mean"].astype(jnp.float32)
    var = params["running_var"].astype(jnp.float32)
    eps = params["eps"]
    weight = params["weight"]                                   # (Cout, Cin, 1, 1)

    n, _, h, w = prev_features[0].shape
    hw = h * w
    group_c = [f.shape[1] for f in prev_features]
    cin = sum(group_c)
    cout = weight.shape[0]
    if out_dtype is None:
        out_dtype = prev_features[0].dtype

    # Fold BN (eval mode) into a per-channel scale/shift.
    scale = gamma / jnp.sqrt(var + eps)                         # (Cin,)
    shift = beta - mean * scale                                 # (Cin,)
    w2d = weight.reshape(cout, cin).astype(mxu_dtype)           # (Cout, Cin)

    # Per-group views: activations stay NCHW (free reshape of the HW axes);
    # the BN affine and the conv weight are split per channel group.
    xs, ss, bs, ws = [], [], [], []
    off = 0
    for f, cg in zip(prev_features, group_c):
        xs.append(f.reshape(n, cg, hw))
        ss.append(scale[off:off + cg].reshape(cg, 1))
        bs.append(shift[off:off + cg].reshape(cg, 1))
        ws.append(w2d[:, off:off + cg])
        off += cg

    in_itemsize = jnp.dtype(prev_features[0].dtype).itemsize
    out_itemsize = jnp.dtype(out_dtype).itemsize
    thw = _pick_hw_tile(hw, cin, cout, in_itemsize, out_itemsize)
    grid = (n, hw // thw)

    x_specs = [
        pl.BlockSpec((pl.Squeezed(), cg, thw), lambda ni, ji: (ni, 0, ji))
        for cg in group_c
    ]
    vec_specs = [pl.BlockSpec((cg, 1), lambda ni, ji: (0, 0)) for cg in group_c]
    w_specs = [pl.BlockSpec((cout, cg), lambda ni, ji: (0, 0)) for cg in group_c]
    out_spec = pl.BlockSpec((pl.Squeezed(), cout, thw), lambda ni, ji: (ni, 0, ji))

    # VMEM budget: double-buffered activation in/out tiles + (tiny) weights &
    # per-channel affine params.  Clamp to stay within v7x's 64 MiB physical.
    est = 2 * thw * (cin * in_itemsize + cout * out_itemsize)
    est += cout * cin * jnp.dtype(mxu_dtype).itemsize + 8 * cin
    vmem_limit = int(min(max(3 * est, 32 << 20), 56 << 20))

    out = pl.pallas_call(
        _make_adapter_kernel(len(prev_features), mxu_dtype),
        out_shape=jax.ShapeDtypeStruct((n, cout, hw), out_dtype),
        grid_spec=pltpu.PrefetchScalarGridSpec(
            num_scalar_prefetch=0,
            grid=grid,
            in_specs=[*x_specs, *vec_specs, *vec_specs, *w_specs],
            out_specs=out_spec,
        ),
        compiler_params=pltpu.CompilerParams(
            dimension_semantics=("parallel", "parallel"),
            vmem_limit_bytes=vmem_limit,
        ),
    )(*xs, *ss, *bs, *ws)

    return out.reshape(n, cout, h, w)


def _reference(prev_features, params):
    x = jnp.concatenate(prev_features, axis=1).astype(jnp.float32)
    g = params["gamma"][None, :, None, None]
    b = params["beta"][None, :, None, None]
    m = params["running_mean"][None, :, None, None]
    v = params["running_var"][None, :, None, None]
    y = g * (x - m) / jnp.sqrt(v + params["eps"]) + b
    y = jnp.maximum(y, 0.0)
    w = params["weight"]  # (Cout, Cin, 1, 1)
    return jnp.einsum("nchw,oc->nohw", y, w.reshape(w.shape[0], w.shape[1]))


if __name__ == "__main__":
    key = jax.random.PRNGKey(0)
    k1, k2, k3, k4, k5, k6 = jax.random.split(key, 6)

    # Two prev_features, each (N=2, C=4, H=16, W=16)  -> num_input_features=8
    feat_a = jax.random.normal(k1, (2, 4, 16, 16), dtype=jnp.float32)
    feat_b = jax.random.normal(k2, (2, 4, 16, 16), dtype=jnp.float32)
    prev_features = [feat_a, feat_b]

    num_input_features = 8
    num_output_features = 16

    params = {
        # BatchNorm2d params (deterministic, synthetic). Eval-mode running stats.
        "gamma": jax.random.uniform(k3, (num_input_features,), minval=0.5, maxval=1.5),
        "beta": jax.random.normal(k4, (num_input_features,)) * 0.1,
        "running_mean": jax.random.normal(k5, (num_input_features,)) * 0.1,
        "running_var": jnp.abs(jax.random.normal(k6, (num_input_features,))) + 0.5,
        "eps": 1e-5,
        # Conv2d 1x1, no bias: (Cout, Cin, 1, 1)
        "weight": jax.random.normal(
            jax.random.fold_in(key, 7), (num_output_features, num_input_features, 1, 1)
        ) * 0.1,
    }

    out = adapter_forward(prev_features, params)
    out = jax.block_until_ready(out)

    ref = _reference(prev_features, params)
    assert out.shape == (2, num_output_features, 16, 16)
    # MXU path runs in bf16 (f32 accumulate) per perf guidance -> loosened
    # tolerance vs. the pure-f32 reference.
    assert jnp.allclose(out, ref, atol=5e-2, rtol=5e-2), "mismatch vs reference"

    print("KERNEL_OK")
</pallas_src>

<mosaic_0001>
module attributes {stable_mosaic.version = 11 : i64} {
  func.func @kernel(%arg0: i32, %arg1: i32, %arg2: memref<1x4x256xf32, #tpu.memory_space<vmem>>, %arg3: memref<1x4x256xf32, #tpu.memory_space<vmem>>, %arg4: memref<4x1xf32, #tpu.memory_space<vmem>>, %arg5: memref<4x1xf32, #tpu.memory_space<vmem>>, %arg6: memref<4x1xf32, #tpu.memory_space<vmem>>, %arg7: memref<4x1xf32, #tpu.memory_space<vmem>>, %arg8: memref<16x4xbf16, #tpu.memory_space<vmem>>, %arg9: memref<16x4xbf16, #tpu.memory_space<vmem>>, %arg10: memref<1x16x256xf32, #tpu.memory_space<vmem>>) attributes {dimension_semantics = [#tpu.dimension_semantics<parallel>, #tpu.dimension_semantics<parallel>], iteration_bounds = array<i64: 2, 1>, scalar_prefetch = 0 : i64, scratch_operands = 0 : i64, tpu.core_type = #tpu.core_type<tc>, window_params = [{transform_indices = @transform_0, window_bounds = array<i64: 1, 4, 256>}, {transform_indices = @transform_1, window_bounds = array<i64: 1, 4, 256>}, {pipeline_mode = #tpu.pipeline_mode<synchronous>, transform_indices = @transform_2, window_bounds = array<i64: 4, 1>}, {pipeline_mode = #tpu.pipeline_mode<synchronous>, transform_indices = @transform_3, window_bounds = array<i64: 4, 1>}, {pipeline_mode = #tpu.pipeline_mode<synchronous>, transform_indices = @transform_4, window_bounds = array<i64: 4, 1>}, {pipeline_mode = #tpu.pipeline_mode<synchronous>, transform_indices = @transform_5, window_bounds = array<i64: 4, 1>}, {pipeline_mode = #tpu.pipeline_mode<synchronous>, transform_indices = @transform_6, window_bounds = array<i64: 16, 4>}, {pipeline_mode = #tpu.pipeline_mode<synchronous>, transform_indices = @transform_7, window_bounds = array<i64: 16, 4>}, {transform_indices = @transform_8, window_bounds = array<i64: 1, 16, 256>}]} {
    %c0 = arith.constant 0 : index
    %c0_0 = arith.constant 0 : index
    %c0_1 = arith.constant 0 : index
    %0 = vector.load %arg2[%c0, %c0_0, %c0_1] : memref<1x4x256xf32, #tpu.memory_space<vmem>>, vector<1x4x256xf32>
    %1 = vector.shape_cast %0 : vector<1x4x256xf32> to vector<4x256xf32>
    %c0_2 = arith.constant 0 : index
    %c0_3 = arith.constant 0 : index
    %2 = vector.load %arg4[%c0_2, %c0_3] : memref<4x1xf32, #tpu.memory_space<vmem>>, vector<4x1xf32>
    %3 = vector.broadcast %2 : vector<4x1xf32> to vector<4x256xf32>
    %4 = arith.mulf %1, %3 : vector<4x256xf32>
    %c0_4 = arith.constant 0 : index
    %c0_5 = arith.constant 0 : index
    %5 = vector.load %arg6[%c0_4, %c0_5] : memref<4x1xf32, #tpu.memory_space<vmem>>, vector<4x1xf32>
    %6 = vector.broadcast %5 : vector<4x1xf32> to vector<4x256xf32>
    %7 = arith.addf %4, %6 : vector<4x256xf32>
    %cst = arith.constant 0.000000e+00 : f32
    %8 = vector.broadcast %cst : f32 to vector<4x256xf32>
    %9 = arith.maximumf %7, %8 : vector<4x256xf32>
    %c0_6 = arith.constant 0 : index
    %c0_7 = arith.constant 0 : index
    %10 = vector.load %arg8[%c0_6, %c0_7] : memref<16x4xbf16, #tpu.memory_space<vmem>>, vector<16x4xbf16>
    %11 = arith.truncf %9 : vector<4x256xf32> to vector<4x256xbf16>
    %cst_8 = arith.constant dense<0.000000e+00> : vector<16x256xf32>
    %12 = tpu.matmul %10, %11, %cst_8 {dimension_numbers = #tpu.dot_dimension_numbers<[1], [0], [0], [1], [0, 0, 1, 1], [], []>} : vector<16x4xbf16>, vector<4x256xbf16>, vector<16x256xf32> -> vector<16x256xf32>
    %c0_9 = arith.constant 0 : index
    %c0_10 = arith.constant 0 : index
    %c0_11 = arith.constant 0 : index
    %13 = vector.load %arg3[%c0_9, %c0_10, %c0_11] : memref<1x4x256xf32, #tpu.memory_space<vmem>>, vector<1x4x256xf32>
    %14 = vector.shape_cast %13 : vector<1x4x256xf32> to vector<4x256xf32>
    %c0_12 = arith.constant 0 : index
    %c0_13 = arith.constant 0 : index
    %15 = vector.load %arg5[%c0_12, %c0_13] : memref<4x1xf32, #tpu.memory_space<vmem>>, vector<4x1xf32>
    %16 = vector.broadcast %15 : vector<4x1xf32> to vector<4x256xf32>
    %17 = arith.mulf %14, %16 : vector<4x256xf32>
    %c0_14 = arith.constant 0 : index
    %c0_15 = arith.constant 0 : index
    %18 = vector.load %arg7[%c0_14, %c0_15] : memref<4x1xf32, #tpu.memory_space<vmem>>, vector<4x1xf32>
    %19 = vector.broadcast %18 : vector<4x1xf32> to vector<4x256xf32>
    %20 = arith.addf %17, %19 : vector<4x256xf32>
    %cst_16 = arith.constant 0.000000e+00 : f32
    %21 = vector.broadcast %cst_16 : f32 to vector<4x256xf32>
    %22 = arith.maximumf %20, %21 : vector<4x256xf32>
    %c0_17 = arith.constant 0 : index
    %c0_18 = arith.constant 0 : index
    %23 = vector.load %arg9[%c0_17, %c0_18] : memref<16x4xbf16, #tpu.memory_space<vmem>>, vector<16x4xbf16>
    %24 = arith.truncf %22 : vector<4x256xf32> to vector<4x256xbf16>
    %cst_19 = arith.constant dense<0.000000e+00> : vector<16x256xf32>
    %25 = tpu.matmul %23, %24, %cst_19 {dimension_numbers = #tpu.dot_dimension_numbers<[1], [0], [0], [1], [0, 0, 1, 1], [], []>} : vector<16x4xbf16>, vector<4x256xbf16>, vector<16x256xf32> -> vector<16x256xf32>
    %26 = arith.addf %12, %25 : vector<16x256xf32>
    %c0_20 = arith.constant 0 : index
    %c0_21 = arith.constant 0 : index
    %c0_22 = arith.constant 0 : index
    %27 = vector.load %arg10[%c0_20, %c0_21, %c0_22] : memref<1x16x256xf32, #tpu.memory_space<vmem>>, vector<1x16x256xf32>
    %28 = vector.shape_cast %27 : vector<1x16x256xf32> to vector<16x256xf32>
    %29 = vector.shape_cast %26 : vector<16x256xf32> to vector<1x16x256xf32>
    tpu.vector_store %arg10[%c0_20, %c0_21, %c0_22], %29 {strides = array<i32>} : memref<1x16x256xf32, #tpu.memory_space<vmem>>, vector<1x16x256xf32>,
    return
  }
  func.func @transform_0(%arg0: i32, %arg1: i32) -> (i32, i32, i32) {
    %c0_i32 = arith.constant 0 : i32
    %c0_i32_0 = arith.constant 0 : i32
    return %arg0, %c0_i32, %arg1 : i32, i32, i32
  }
  func.func @transform_1(%arg0: i32, %arg1: i32) -> (i32, i32, i32) {
    %c0_i32 = arith.constant 0 : i32
    %c0_i32_0 = arith.constant 0 : i32
    return %arg0, %c0_i32, %arg1 : i32, i32, i32
  }
  func.func @transform_2(%arg0: i32, %arg1: i32) -> (i32, i32) {
    %c0_i32 = arith.constant 0 : i32
    %c0_i32_0 = arith.constant 0 : i32
    %c0_i32_1 = arith.constant 0 : i32
    return %c0_i32, %c0_i32_0 : i32, i32
  }
  func.func @transform_3(%arg0: i32, %arg1: i32) -> (i32, i32) {
    %c0_i32 = arith.constant 0 : i32
    %c0_i32_0 = arith.constant 0 : i32
    %c0_i32_1 = arith.constant 0 : i32
    return %c0_i32, %c0_i32_0 : i32, i32
  }
  func.func @transform_4(%arg0: i32, %arg1: i32) -> (i32, i32) {
    %c0_i32 = arith.constant 0 : i32
    %c0_i32_0 = arith.constant 0 : i32
    %c0_i32_1 = arith.constant 0 : i32
    return %c0_i32, %c0_i32_0 : i32, i32
  }
  func.func @transform_5(%arg0: i32, %arg1: i32) -> (i32, i32) {
    %c0_i32 = arith.constant 0 : i32
    %c0_i32_0 = arith.constant 0 : i32
    %c0_i32_1 = arith.constant 0 : i32
    return %c0_i32, %c0_i32_0 : i32, i32
  }
  func.func @transform_6(%arg0: i32, %arg1: i32) -> (i32, i32) {
    %c0_i32 = arith.constant 0 : i32
    %c0_i32_0 = arith.constant 0 : i32
    %c0_i32_1 = arith.constant 0 : i32
    return %c0_i32, %c0_i32_0 : i32, i32
  }
  func.func @transform_7(%arg0: i32, %arg1: i32) -> (i32, i32) {
    %c0_i32 = arith.constant 0 : i32
    %c0_i32_0 = arith.constant 0 : i32
    %c0_i32_1 = arith.constant 0 : i32
    return %c0_i32, %c0_i32_0 : i32, i32
  }
  func.func @transform_8(%arg0: i32, %arg1: i32) -> (i32, i32, i32) {
    %c0_i32 = arith.constant 0 : i32
    %c0_i32_0 = arith.constant 0 : i32
    return %arg0, %c0_i32, %arg1 : i32, i32, i32
  }
}

</mosaic_0001>

<bundles_post_ra>
// kernel: tpu_custom_call.1
= control target key start
LH: loop header
LB: loop body
LE: loop exit
PB: predicated region body
PF: predicated region fallthrough
CT: control target
= control target key end

     0   :  { %13 = vsyncpa [#allocation3], 0  ;;  %s1036_s0 = inlined_call_operand.vmem [shape: f32[2,4,256], index: 0, kind: input, shape index: {}]   ;;  %s1037_s1 = inlined_call_operand.vmem [shape: f32[2,4,256], index: 1, kind: input, shape index: {}]   ;;  %s1038_s2 = inlined_call_operand.vmem [shape: f32[4,1], index: 2, kind: input, shape index: {}]   ;;  %s1039_s3 = inlined_call_operand.vmem [shape: f32[4,1], index: 3, kind: input, shape index: {}]   ;;  %s1040_s4 = inlined_call_operand.vmem [shape: f32[4,1], index: 4, kind: input, shape index: {}]   ;;  %s1041_s5 = inlined_call_operand.vmem [shape: f32[4,1], index: 5, kind: input, shape index: {}]   ;;  %s1042_s6 = inlined_call_operand.vmem [shape: bf16[16,4], index: 6, kind: input, shape index: {}]   ;;  %s1043_s7 = inlined_call_operand.vmem [shape: bf16[16,4], index: 7, kind: input, shape index: {}]   ;;  %s1044_s8 = inlined_call_operand.hbm [shape: f32[2,16,256], index: 8, kind: output, shape index: {}]  }
   0x1   :  { %15 = vsyncpa [#allocation3 + $0x1], 0  ;;  %s900_s27 = smov 0   ;;  %s902_s28 = smov 0  }
   0x2   :  { %s904_s29 = smov 0   ;;  %s906_s30 = smov 0  }
   0x3   :  { %s908_s9 = smov 0   ;;  %s910_s10 = smov 0  }
   0x4 LB: > { %s679_s11 = sadd.s32 4294967295, %s848_s10   ;;  %s680_s12 = sadd.s32 4294967294, %s848_s10   ;;  %s848_s10 = sphi %s910_s10, %s21_s10   ;;  %s844_s9 = sphi %s908_s9, %s1051_s9   ;;  %s840_s30 = sphi %s906_s30, %s1050_s30   ;;  %s836_s29 = sphi %s904_s29, %s1049_s29   ;;  %s832_s28 = sphi %s902_s28, %s1048_s28   ;;  %s828_s27 = sphi %s900_s27, %s1047_s27  }
   0x5   : > { %s33_s13 = sadd.s32 1, %s844_s9  ;;  %s224_s14 = sadd.s32 1, %s836_s29 }
   0x6   : > { %p35_p0 = scmp.ge.s32.totalorder %s33_s13, 2  ;;  %p234_p1 = scmp.ne.s32.totalorder %s836_s29, %s832_s28 }
   0x7   : > { %p235_p2 = scmp.eq.s32.totalorder %s679_s11, 1  ;;  %p240_p3 = scmp.ne.s32.totalorder %s832_s28, %s828_s27 }
   0x8   : > { %s1053_s13 = smov (%p35_p0, %s33_s13), 0  ;;  %p241_p5 = scmp.eq.s32.totalorder %s680_s12, 1 }
   0x9   : > { %p940_p4 = por %p235_p2, %p234_p1  ;;  %s219_s16 = ssub.s32 %s844_s9, %s1053_s13 }
   0xa   : > { %p683_p6 = scmp.ge.s32.totalorder %s848_s10, 1  ;;  %p222_p7 = scmp.eq.s32.totalorder %s219_s16, 0 }
   0xb   : > { %p947_p8 = por %p241_p5, %p240_p3  ;;  %p303_p9 = scmp.lt.s32.totalorder %s848_s10, 3 }
   0xc   : > { %s953_s18 = scalar_select %p222_p7, %s836_s29, %s224_s14  }
   0xd   : > { %p304_p10 = pnand %p683_p6, %p303_p9 }
   0xe   : > { %v387_v0 = vld [vmem:[%s1040_s4] sm:$0xf] (!%p304_p10)  ;;  %v850_v2 = vmov (!%p304_p10), 0   ;;  %p351_p11 = scmp.lt.s32.totalorder (!%p304_p10), %s840_s30, 1  ;;  %v851_v5 = vmov (!%p304_p10), 839922192   ;;  %v381_v7 = vlaneseq (!%p304_p10) }
   0xf   : > { %307 = sbr.rel (%p304_p10) target bundleno = 396 (0x18c), region = 52  ;;  %v373_v1 = vld [vmem:[%s1038_s2] sm:$0xf] (!%p304_p10)  ;;  %767 = vset.pattern.permute.xlu1 (!%p304_p10), %v850_v2  ;;  %766 = vset.pattern.permute.xlu0 (!%p304_p10), %v850_v2  ;;  %v379_v6 = vunpack.c.l.s4 (!%p304_p10), %v851_v5  ;;  %vm455_vm0 = vcmask (!%p304_p10), 1041408   ;;  %vm451_vm1 = vcmask (!%p304_p10), 31744   ;;  %s852_s24 = smov (!%p304_p10), [#allocation2]  }
  0x10   : > { %390 = vperm.xlu1 (!%p304_p10), %767, %v387_v0   ;;  %376 = vperm.xlu0 (!%p304_p10), %766, %v373_v1   ;;  %v424_v3 = vld [vmem:[%s1041_s5] sm:$0xf] (!%p304_p10)  ;;  %v382_v9 = vshrl.u32 (!%p304_p10), %v381_v7, 7  ;;  %s774_s25 = sshll.u32 (!%p304_p10), %s852_s24, 4  ;;  %s775_s25 = int_to_ptr.vmem [resolvable:$false] %s774_s25 }
  0x11   : > { %v410_v4 = vld [vmem:[%s1039_s3] sm:$0xf] (!%p304_p10)  ;;  %551 = vmatprep.mubr.bf16.mxu0 (!%p304_p10), %v850_v2  ;;  %494 = vmatprep.mubr.bf16.mxu1 (!%p304_p10), %v850_v2  ;;  %v380_v8 = vunpack.c.0.s8 (!%p304_p10), %v379_v6  ;;  %s776_s26 = scalar_lea.vmem (!%p304_p10), %s775_s25, 1024 }
  0x12   : > { %v768_v33 = vld [vmem:[%s1042_s6] sm:$0xff] (!%p304_p10)  }
  0x13   : > { %v383_v10 = vsub.s32 (!%p304_p10), %v380_v8, %v382_v9  ;;  %v769_v36 = vld [vmem:[%s1043_s7] sm:$0xff] (!%p304_p10)  }
  0x14   : > { %427 = vperm.xlu1 (!%p304_p10), %767, %v424_v3   ;;  %413 = vperm.xlu0 (!%p304_p10), %766, %v410_v4  }
  0x16   : > { %s352_s11 = scalar_select %p351_p11, %s840_s30, 1 }
  0x18   : > { %s700_s12 = sshll.u32 %s352_s11, 3  ;;  %s347_s11 = sand.u32 1, %s832_s28  }
  0x19   : > { %s358_s19 = scalar_lea.vmem %s1036_s0, %s700_s12  ;;  %s368_s22 = scalar_lea.vmem %s1037_s1, %s700_s12 }
  0x1a   : > { %v372_v13 = vld [vmem:[%s358_s19] sm:$0xff]  ;;  %s684_s12 = sshll.u32 %s347_s11, 5  ;;  %s702_s19 = sshll.u32 %s840_s30, 9 }
  0x1b   : > { %v409_v19 = vld [vmem:[%s368_s22] sm:$0xff]  ;;  %s349_s14 = scalar_lea.vmem [#allocation2], %s684_s12  ;;  %s988_s22 = scalar_lea.hbm %s1044_s8, %s702_s19 }
  0x1c   : > { %s582_s16 = sshll.u32 %s349_s14, 4  ;;  %s990_s30 = scalar_lea.sflag [#allocation3], %s347_s11  ;;  %s983_s16 = int_to_ptr.vmem [resolvable:$true] %s582_s16 }
  0x1d   : > { %s770_s23 = scalar_lea.vmem %s983_s16, 512  ;;  %p777_p1 = scmp.lt.s32.totalorder %s983_s16, %s775_s25 }
  0x1e   : > { %p771_p12 = scmp.ne.s32.totalorder %s983_s16, %s770_s23  ;;  %p778_p2 = scmp.lt.s32.totalorder %s776_s26, %s770_s23 }
  0x20   : > { %p772_p13 = pnand %p771_p12, %p940_p4  ;;  %p779_p3 = por %p778_p2, %p777_p1 }
  0x22   : > { %p773_p0 = pneg %p772_p13 }
  0x24   : > { %p780_p5 = pnand %p779_p3, %p773_p0 }
  0x8f   : > { %v391_v11 = vpop.permute.xlu1 %390  ;;  %v377_v12 = vpop.permute.xlu0 %376 }
  0x90   : > { %v398_v14 = vrot.slane %v391_v11, %v383_v10  ;;  %v384_v15 = vrot.slane %v377_v12, %v383_v10 }
  0x92   : > { %v386_v16 = vmul.f32 %v384_v15, %v372_v13 }
  0x93   : > { %v428_v17 = vpop.permute.xlu1 %427  ;;  %v414_v18 = vpop.permute.xlu0 %413 }
  0x94   : > { %v421_v20 = vrot.slane %v414_v18, %v383_v10  ;;  %v400_v21 = vadd.f32 %v398_v14, %v386_v16  ;;  %v435_v22 = vrot.slane %v428_v17, %v383_v10 }
  0x96   : > { %v423_v23 = vmul.f32 %v421_v20, %v409_v19  ;;  %v401_v24 = vmax.f32 %v400_v21, 0.0 }
  0x98   : > { %v405_v25 = vcombine.high %v401_v24, %v401_v24  ;;  %v407_v26 = vpack.c.bf16 %v401_v24, %v401_v24  ;;  %v437_v27 = vadd.f32 %v435_v22, %v423_v23 }
  0x9a   : > { %v408_v28 = vpack.c.bf16 %v405_v25, %v405_v25  ;;  %v438_v29 = vmax.f32 %v437_v27, 0.0  ;;  %v514_v30 = vsel %vm455_vm0, %v407_v26, 0 }
  0x9c   : > { %693 = vmatprep.subr.msk.bf16.mxu0 %vm455_vm0, %v408_v28  ;;  %v442_v31 = vcombine.high %v438_v29, %v438_v29  ;;  %v444_v32 = vpack.c.bf16 %v438_v29, %v438_v29 }
  0x9d   : > { %520 = vmatpush1.bf16.msra.mxu0 %v514_v30 }
  0x9e   : > { %v445_v34 = vpack.c.bf16 %v442_v31, %v442_v31  ;;  %v457_v35 = vsel %vm455_vm0, %v444_v32, 0 }
  0xa0   : > { %690 = vmatprep.subr.msk.bf16.mxu1 %vm455_vm0, %v445_v34  ;;  %694 = vmatmul.mubr.msk.bf16.vlgmr.msra.gmra.mrb[0].mxu0 %vm451_vm1, %v768_v33 }
  0xa1   : > { %463 = vmatpush1.bf16.msra.mxu1 %v457_v35 }
  0xa4   : > { %691 = vmatmul.mubr.msk.bf16.vlgmr.msra.gmra.mrb[0].mxu1 %vm451_vm1, %v769_v36 }
 0x173   : > { %v553_v37 = vpop.f32.mrb[0].mxu0 }
 0x174   : > { %v555_v38 = vpop.f32.mrb[1].mxu0 }
 0x175   : > { %v557_v39 = vpop.f32.mrb[2].mxu0 }
 0x176   : > { %v559_v40 = vpop.f32.mrb[3].mxu0 }
 0x177   : > { %v496_v41 = vpop.f32.mrb[0].mxu1 }
 0x178   : > { %v554_v42 = vadd.f32 %v553_v37, %v496_v41  ;;  %v498_v43 = vpop.f32.mrb[1].mxu1 }
 0x179   : > { %v556_v44 = vadd.f32 %v555_v38, %v498_v43  ;;  %v500_v45 = vpop.f32.mrb[2].mxu1 }
 0x17a   : > { %562 = vst [vmem:[%s349_s14] sm:$0xff] %v554_v42  ;;  %v558_v46 = vadd.f32 %v557_v39, %v500_v45  ;;  %v502_v47 = vpop.f32.mrb[3].mxu1 }
 0x17b   : > { %563 = vst [vmem:[%s349_s14 + $0x8] sm:$0xff] %v556_v44  ;;  %v560_v48 = vadd.f32 %v559_v40, %v502_v47 }
 0x17c   : > { %564 = vst [vmem:[%s349_s14 + $0x10] sm:$0xff] %v558_v46 }
 0x17d   : > { %565 = vst [vmem:[%s349_s14 + $0x18] sm:$0xff] %v560_v48 }
 0x17e   : > { %783 = shalt.err (!%p780_p5)
}
 0x17f   : > { %s784_s11 = scalar_lea.hbm %s988_s22, 512  ;;  %s788_s19 = scalar_lea.hbm %s1044_s8, 1024 }
 0x180   : > { %p785_p6 = scmp.ne.s32.totalorder %s988_s22, %s784_s11  ;;  %p789_p10 = scmp.lt.u32.totalorder %s988_s22, %s1044_s8 }
 0x181   : > { %p790_p11 = scmp.lt.u32.totalorder %s788_s19, %s784_s11  ;;  %p792_p13 = scmp.lt.u32.totalorder %s784_s11, %s988_s22 }
 0x182   : > { %p786_p7 = pnand %p785_p6, %p940_p4 }
 0x183   : > { %p791_p12 = por %p790_p11, %p789_p10 }
 0x184   : > { %p787_p9 = pneg %p786_p7 }
 0x185   : > { %p793_p0 = por %p792_p13, %p791_p12 }
 0x187   : > { %p794_p1 = pnand %p793_p0, %p787_p9 }
 0x189   : > { %797 = shalt.err (!%p794_p1)
}
 0x18a   : > { %s853_s23 = smov 256   ;;  %s854_s24 = smov 16  }
 0x18b   : > { %707 = dma.vmem_to_hbm [thread:$0]  (%p940_p4), %s983_s16, 512, %s988_s22, %s990_s30, %s853_s23, %s853_s23, %s854_s24  }
 0x18c PF: > { %p713_p2 = scmp.ge.s32.totalorder %s848_s10, 2  ;;  %s597_s25 = sand.u32 1, %s828_s27  }
 0x18d   : > { %s598_s26 = scalar_lea.sflag [#allocation3], %s597_s25 }
 0x18e   : > { %p710_p3 = pnand %p713_p2, %p947_p8 }
 0x190   : > { %823 = dma.done.wait (!%p710_p3), %s598_s26, 512  }
 0x191   : > { %825 = vsyncadd (!%p710_p3), %s598_s26, 4294966784  ;;  %s21_s10 = sadd.s32 1, %s848_s10   ;;  %s1047_s27 = smov %s832_s28 }
 0x192   : > { %p18_p5 = scmp.ge.s32.totalorder %s21_s10, 4   ;;  %s1048_s28 = smov %s836_s29 }
 0x193   : > { %s1049_s29 = smov %s953_s18  ;;  %s1050_s30 = smov %s844_s9 }
 0x194   : > { %s1051_s9 = smov %s1053_s13  ;;  %20 = sbr.rel (!%p18_p5) target bundleno = 4 (0x4), region = 90 }
 0x19b   :  { %603 = vsyncpa [#allocation3], 1 }
 0x19c   :  { %605 = vsyncpa [#allocation3 + $0x1], 1 }

</bundles_post_ra>
